<compile_context>
chip_gen: v6e
topology: v6e:2x2x1
jax: 0.10.0
libtpu: 0.0.40
codegen_flags: <defaults>
</compile_context>

<pallas_src>
import jax
import jax.numpy as jnp
from jax.experimental import pallas as pl
from jax.experimental.pallas import tpu as pltpu

IN_FEATURES = 344
HIDDEN = 256


def _round_up(x, m):
    return ((x + m - 1) // m) * m


def _cdiv(a, b):
    return (a + b - 1) // b


def mlp_kernel(x_ref, w1_ref, b1_ref, w2_ref, b2_ref, o_ref):
    # Cast the streamed f32 tile to bf16 in-kernel (no extra HBM pass).
    x = x_ref[...].astype(jnp.bfloat16)
    # fc1 on the MXU: bf16 operands, f32 accumulation.
    h = jnp.dot(x, w1_ref[...], preferred_element_type=jnp.float32)
    # Bias + ReLU in f32 on the VPU.
    h = jnp.maximum(h + b1_ref[...], 0.0)
    # fc2 has N=1: VPU multiply + XLU lane reduction instead of a 1-column MXU pass.
    o = jnp.sum(h * w2_ref[...], axis=-1, keepdims=True)
    # b2 is an SMEM scalar.
    o_ref[...] = o + b2_ref[0, 0]


def audio_classifier_forward(x, w1_t, b1, w2_row, b2, *, block_b=2048):
    """x: (B, 344) f32. Returns (B, 1) f32, matching PyTorch fc2(relu(fc1(x))).

    w1_t: (344, 256) bf16 (pre-cast at init), b1: (1, 256) f32,
    w2_row: (1, 256) f32, b2: (1, 1) f32.
    fc1 operands are bf16 (x cast in-kernel); accumulation/epilogue are f32.
    """
    B, K = x.shape
    assert K == IN_FEATURES
    assert w1_t.shape == (IN_FEATURES, HIDDEN)

    # Pre-cast weights once per call if the caller didn't (init_params does).
    if w1_t.dtype != jnp.bfloat16:
        w1_t = w1_t.astype(jnp.bfloat16)

    # Batch tile selection:
    #   * small B: one tile rounded up to a multiple of 16 (bf16 sublane packing)
    #   * large B: block_b, but guarantee >= 2 grid steps when B exceeds one
    #     tile so the "parallel" axis splits across v7x's two TensorCores.
    if B <= block_b:
        tb = _round_up(B, 16)
    else:
        tb = min(block_b, _round_up(_cdiv(B, 2), 16))
    b_pad = _round_up(B, tb)

    x_p = x
    if b_pad != B:
        x_p = jnp.pad(x, ((0, b_pad - B), (0, 0)))

    grid = (b_pad // tb,)

    # Only set an explicit VMEM limit when the double-buffered x working set
    # would exceed the default scoped limit (relevant for very large block_b,
    # especially on v7x with 64 MiB physical VMEM).
    x_tile_bytes = tb * IN_FEATURES * 4
    weight_bytes = IN_FEATURES * HIDDEN * 2 + 2 * HIDDEN * 4 + 4
    vmem_need = 2 * x_tile_bytes + 2 * weight_bytes + 2 * tb * 4
    compiler_kwargs = dict(
        dimension_semantics=("parallel",),  # shard batch tiles across v7x's 2 TCs
    )
    if vmem_need > (24 << 20):
        compiler_kwargs["vmem_limit_bytes"] = min(vmem_need + (4 << 20), 56 << 20)

    cost = pl.CostEstimate(
        flops=2 * b_pad * IN_FEATURES * HIDDEN + 3 * b_pad * HIDDEN,
        transcendentals=0,
        bytes_accessed=b_pad * IN_FEATURES * 4 + weight_bytes + b_pad * 4,
    )

    out = pl.pallas_call(
        mlp_kernel,
        out_shape=jax.ShapeDtypeStruct((b_pad, 1), jnp.float32),
        grid=grid,
        in_specs=[
            # x streams per batch tile as f32 (344 == full last dim, so legal);
            # weights/biases use constant blocks -> VMEM-resident, DMA'd once.
            pl.BlockSpec((tb, IN_FEATURES), lambda i: (i, 0)),        # x   (tb, 344) f32
            pl.BlockSpec((IN_FEATURES, HIDDEN), lambda i: (0, 0)),    # w1  (344, 256) bf16
            pl.BlockSpec((1, HIDDEN), lambda i: (0, 0)),              # b1  (1, 256)  f32
            pl.BlockSpec((1, HIDDEN), lambda i: (0, 0)),              # w2  (1, 256)  f32
            pl.BlockSpec(memory_space=pltpu.MemorySpace.SMEM),        # b2  (1, 1)    f32 scalar
        ],
        # last-dim=1 output => masked stores, but writeback is only 4*B bytes.
        out_specs=pl.BlockSpec((tb, 1), lambda i: (i, 0)),
        compiler_params=pltpu.CompilerParams(**compiler_kwargs),
        cost_estimate=cost,
    )(x_p, w1_t, b1, w2_row, b2)

    return out[:B]


def init_params(key):
    """Deterministic init mimicking nn.Linear default (uniform(-1/sqrt(fan_in), +)).

    w1 is stored transposed (in, out) and pre-cast to bf16 once, so the kernel
    computes x @ W1 directly on the MXU with no per-call weight prep.
    """
    k1, k2, k3, k4 = jax.random.split(key, 4)
    bound1 = 1.0 / jnp.sqrt(IN_FEATURES)
    bound2 = 1.0 / jnp.sqrt(HIDDEN)
    w1_t = jax.random.uniform(k1, (IN_FEATURES, HIDDEN), jnp.float32, -bound1, bound1)
    b1 = jax.random.uniform(k2, (1, HIDDEN), jnp.float32, -bound1, bound1)
    w2_row = jax.random.uniform(k3, (1, HIDDEN), jnp.float32, -bound2, bound2)
    b2 = jax.random.uniform(k4, (1, 1), jnp.float32, -bound2, bound2)
    return w1_t.astype(jnp.bfloat16), b1, w2_row, b2


if __name__ == "__main__":
    key = jax.random.PRNGKey(0)
    kx, kp = jax.random.split(key)

    B = 8
    x = jax.random.normal(kx, (B, IN_FEATURES), jnp.float32)
    w1_bf16, b1, w2_row, b2 = init_params(kp)

    out = audio_classifier_forward(x, w1_bf16, b1, w2_row, b2)
    out = jax.block_until_ready(out)
    assert out.shape == (B, 1)

    # Reference with the same bf16 fc1 operands / f32 accumulation as the kernel.
    h_ref = jnp.dot(x.astype(jnp.bfloat16), w1_bf16,
                    preferred_element_type=jnp.float32) + b1
    h_ref = jnp.maximum(h_ref, 0.0)
    ref = jnp.sum(h_ref * w2_row, axis=-1, keepdims=True) + b2
    assert jnp.allclose(out, ref, atol=1e-3, rtol=1e-3)

    # Sanity against full-f32 math (bf16 fc1 operands introduce ~1e-3 rel error).
    # TODO(synk): if the classifier needs full f32 precision, keep x in f32 and
    # only cast w1 to bf16 (MXU-legal, same K-pass count).
    w1_f32 = w1_bf16.astype(jnp.float32)
    ref_f32 = jnp.maximum(x @ w1_f32 + b1, 0.0) @ w2_row.T + b2
    assert jnp.allclose(out, ref_f32, atol=5e-2, rtol=5e-2)

    print("KERNEL_OK")
</pallas_src>

<mosaic_0001>
module attributes {stable_mosaic.version = 11 : i64} {
  func.func @mlp_kernel(%arg0: i32, %arg1: memref<16x344xf32, #tpu.memory_space<vmem>>, %arg2: memref<344x256xbf16, #tpu.memory_space<vmem>>, %arg3: memref<1x256xf32, #tpu.memory_space<vmem>>, %arg4: memref<1x256xf32, #tpu.memory_space<vmem>>, %arg5: memref<1x1xf32, #tpu.memory_space<smem>>, %arg6: memref<16x1xf32, #tpu.memory_space<vmem>>) attributes {dimension_semantics = [#tpu.dimension_semantics<parallel>], iteration_bounds = array<i64: 1>, scalar_prefetch = 0 : i64, scratch_operands = 0 : i64, tpu.core_type = #tpu.core_type<tc>, window_params = [{transform_indices = @transform_0, window_bounds = array<i64: 16, 344>}, {pipeline_mode = #tpu.pipeline_mode<synchronous>, transform_indices = @transform_1, window_bounds = array<i64: 344, 256>}, {pipeline_mode = #tpu.pipeline_mode<synchronous>, transform_indices = @transform_2, window_bounds = array<i64: 1, 256>}, {pipeline_mode = #tpu.pipeline_mode<synchronous>, transform_indices = @transform_3, window_bounds = array<i64: 1, 256>}, {transform_indices = @transform_4, window_bounds = array<i64: 1, 1>}, {transform_indices = @transform_5, window_bounds = array<i64: 16, 1>}]} {
    %c0 = arith.constant 0 : index
    %c0_0 = arith.constant 0 : index
    %0 = vector.load %arg1[%c0, %c0_0] : memref<16x344xf32, #tpu.memory_space<vmem>>, vector<16x344xf32>
    %1 = arith.truncf %0 : vector<16x344xf32> to vector<16x344xbf16>
    %c0_1 = arith.constant 0 : index
    %c0_2 = arith.constant 0 : index
    %2 = vector.load %arg2[%c0_1, %c0_2] : memref<344x256xbf16, #tpu.memory_space<vmem>>, vector<344x256xbf16>
    %cst = arith.constant dense<0.000000e+00> : vector<16x256xf32>
    %3 = tpu.matmul %1, %2, %cst {dimension_numbers = #tpu.dot_dimension_numbers<[1], [0], [0], [1], [0, 0, 1, 1], [], []>} : vector<16x344xbf16>, vector<344x256xbf16>, vector<16x256xf32> -> vector<16x256xf32>
    %c0_3 = arith.constant 0 : index
    %c0_4 = arith.constant 0 : index
    %4 = vector.load %arg3[%c0_3, %c0_4] : memref<1x256xf32, #tpu.memory_space<vmem>>, vector<1x256xf32>
    %5 = vector.broadcast %4 : vector<1x256xf32> to vector<16x256xf32>
    %6 = arith.addf %3, %5 : vector<16x256xf32>
    %cst_5 = arith.constant 0.000000e+00 : f32
    %7 = vector.broadcast %cst_5 : f32 to vector<16x256xf32>
    %8 = arith.maximumf %6, %7 : vector<16x256xf32>
    %c0_6 = arith.constant 0 : index
    %c0_7 = arith.constant 0 : index
    %9 = vector.load %arg4[%c0_6, %c0_7] : memref<1x256xf32, #tpu.memory_space<vmem>>, vector<1x256xf32>
    %10 = vector.broadcast %9 : vector<1x256xf32> to vector<16x256xf32>
    %11 = arith.mulf %8, %10 : vector<16x256xf32>
    %cst_8 = arith.constant dense<0.000000e+00> : vector<16xf32>
    %12 = vector.multi_reduction <add>, %11, %cst_8 [1] : vector<16x256xf32> to vector<16xf32>
    %13 = vector.shape_cast %12 : vector<16xf32> to vector<16x1xf32>
    %c0_9 = arith.constant 0 : index
    %c0_10 = arith.constant 0 : index
    %14 = memref.load %arg5[%c0_9, %c0_10] : memref<1x1xf32, #tpu.memory_space<smem>>
    %15 = vector.broadcast %14 : f32 to vector<16x1xf32>
    %16 = arith.addf %13, %15 : vector<16x1xf32>
    %c0_11 = arith.constant 0 : index
    %c0_12 = arith.constant 0 : index
    %17 = vector.load %arg6[%c0_11, %c0_12] : memref<16x1xf32, #tpu.memory_space<vmem>>, vector<16x1xf32>
    tpu.vector_store %arg6[%c0_11, %c0_12], %16 {strides = array<i32>} : memref<16x1xf32, #tpu.memory_space<vmem>>, vector<16x1xf32>,
    return
  }
  func.func @transform_0(%arg0: i32) -> (i32, i32) {
    %c0_i32 = arith.constant 0 : i32
    %c0_i32_0 = arith.constant 0 : i32
    return %arg0, %c0_i32 : i32, i32
  }
  func.func @transform_1(%arg0: i32) -> (i32, i32) {
    %c0_i32 = arith.constant 0 : i32
    %c0_i32_0 = arith.constant 0 : i32
    %c0_i32_1 = arith.constant 0 : i32
    return %c0_i32, %c0_i32_0 : i32, i32
  }
  func.func @transform_2(%arg0: i32) -> (i32, i32) {
    %c0_i32 = arith.constant 0 : i32
    %c0_i32_0 = arith.constant 0 : i32
    %c0_i32_1 = arith.constant 0 : i32
    return %c0_i32, %c0_i32_0 : i32, i32
  }
  func.func @transform_3(%arg0: i32) -> (i32, i32) {
    %c0_i32 = arith.constant 0 : i32
    %c0_i32_0 = arith.constant 0 : i32
    %c0_i32_1 = arith.constant 0 : i32
    return %c0_i32, %c0_i32_0 : i32, i32
  }
  func.func @transform_4(%arg0: i32) -> (i32, i32) {
    %c0_i32 = arith.constant 0 : i32
    %c0_i32_0 = arith.constant 0 : i32
    %c0_i32_1 = arith.constant 0 : i32
    return %c0_i32, %c0_i32_0 : i32, i32
  }
  func.func @transform_5(%arg0: i32) -> (i32, i32) {
    %c0_i32 = arith.constant 0 : i32
    %c0_i32_0 = arith.constant 0 : i32
    return %arg0, %c0_i32 : i32, i32
  }
}

</mosaic_0001>

<bundles_post_ra>
// kernel: tpu_custom_call.1
= control target key start
LH: loop header
LB: loop body
LE: loop exit
PB: predicated region body
PF: predicated region fallthrough
CT: control target
= control target key end

     0   :  { %11 = vsyncpa [#allocation4], 0  ;;  %s685_s0 = inlined_call_operand.hbm [shape: f32[16,344], index: 0, kind: input, shape index: {}]   ;;  %s686_s1 = inlined_call_operand.hbm [shape: bf16[344,256], index: 1, kind: input, shape index: {}]   ;;  %s687_s2 = inlined_call_operand.vmem [shape: f32[1,256], index: 2, kind: input, shape index: {}]   ;;  %s688_s3 = inlined_call_operand.vmem [shape: f32[1,256], index: 3, kind: input, shape index: {}]   ;;  %s689_s4 = inlined_call_operand.<no memory space> [shape: f32[1,1], index: 4, kind: input, shape index: {}]   ;;  %s690_s5 = inlined_call_operand.vmem [shape: f32[16,1], index: 5, kind: output, shape index: {}]  }
   0x1   :  { %12 = vsyncpa [#allocation6], 0  ;;  %s627_s18 = smov [#allocation3]  }
   0x2   :  { %s18_s19 = sshll.u32 %s627_s18, 4  ;;  %s19_s19 = int_to_ptr.vmem [resolvable:$true] %s18_s19 }
   0x3   :  { %s591_s20 = scalar_lea.vmem %s19_s19, 768  ;;  %p596_p1 = scmp.lt.s32.totalorder %s19_s19, %s19_s19 }
   0x4   :  { %p592_p0 = scmp.ne.s32.totalorder %s19_s19, %s591_s20  ;;  %p597_p2 = scmp.lt.s32.totalorder %s591_s20, %s591_s20 }
   0x6   :  { %p598_p3 = por %p597_p2, %p596_p1 }
   0x8   :  { %p599_p4 = pnand %p598_p3, %p592_p0 }
   0xa   :  { %602 = shalt.err (!%p599_p4)
}
   0xb   :  { %s628_s21 = smov 384   ;;  %s629_s22 = smov 24  }
   0xc   :  { %24 = dma.hbm_to_vmem [thread:$0]  %s685_s0, 768, %s19_s19, [#allocation4], %s628_s21, %s628_s21, %s629_s22  }
   0xd   :  { %s630_s25 = smov [#allocation5]  }
   0xe   :  { %s30_s26 = sshll.u32 %s630_s25, 4  ;;  %s31_s26 = int_to_ptr.vmem [resolvable:$true] %s30_s26 }
   0xf   :  { %s611_s27 = scalar_lea.vmem %s31_s26, 5504  ;;  %p616_p6 = scmp.lt.s32.totalorder %s31_s26, %s31_s26 }
  0x10   :  { %p612_p5 = scmp.ne.s32.totalorder %s31_s26, %s611_s27  ;;  %p617_p7 = scmp.lt.s32.totalorder %s611_s27, %s611_s27 }
  0x12   :  { %p618_p8 = por %p617_p7, %p616_p6 }
  0x14   :  { %p619_p9 = pnand %p618_p8, %p612_p5 }
  0x16   :  { %622 = shalt.err (!%p619_p9)
}
  0x17   :  { %s631_s28 = smov 128   ;;  %s632_s29 = smov 8  }
  0x18   :  { %36 = dma.hbm_to_vmem [thread:$0]  %s686_s1, 5504, %s31_s26, [#allocation6], %s631_s28, %s631_s28, %s632_s29  }
  0x19   :  { %623 = dma.done.wait [#allocation4], 768  }
  0x1a   :  { %624 = vsyncadd [#allocation4], 4294966528 }
  0x1b   :  { %625 = dma.done.wait [#allocation6], 5504  }
  0x1c   :  { %626 = vsyncadd [#allocation6], 4294961792  ;;  %v633_v0 = vmov 0   ;;  %v518_v1 = vld [vmem:[#allocation5 + $0x74] ss:$8 sps:$4 sm:$0xff]   ;;  %vm333_vm0 = vcmask 1043456   ;;  %v104_v56 = vlaneseq }
  0x1d   :  { %415 = vmatprep.mubr.bf16.mxu1 %v633_v0  ;;  %v520_v2 = vld [vmem:[#allocation5 + $0x70] ss:$8 sps:$4 sm:$0xff]   ;;  %340 = vmatprep.subr.bf16.mxu0 %v518_v1  ;;  %v521_v3 = vld [vmem:[#allocation5 + $0x64] ss:$8 sps:$4 sm:$0xff]   ;;  %v523_v4 = vld [vmem:[#allocation5 + $0x60] ss:$8 sps:$4 sm:$0xff]  }
  0x1e   :  { %341 = vmatpush1.bf16.msra.mxu0 %v520_v2  ;;  %v524_v5 = vld [vmem:[#allocation5 + $0x54] ss:$8 sps:$4 sm:$0xff]   ;;  %v526_v6 = vld [vmem:[#allocation5 + $0x50] ss:$8 sps:$4 sm:$0xff]   ;;  %v527_v7 = vld [vmem:[#allocation5 + $0x44] ss:$8 sps:$4 sm:$0xff]  }
  0x1f   :  { %342 = vmatprep.subr.bf16.mxu0 %v521_v3  ;;  %v529_v8 = vld [vmem:[#allocation5 + $0x40] ss:$8 sps:$4 sm:$0xff]   ;;  %v530_v9 = vld [vmem:[#allocation5 + $0x34] ss:$8 sps:$4 sm:$0xff]   ;;  %v532_v13 = vld [vmem:[#allocation5 + $0x30] ss:$8 sps:$4 sm:$0xff]  }
  0x20   :  { %v101_v10 = vld [vmem:[#allocation5 + $0x150] sm:$0xff]  ;;  %v552_v14 = vld [vmem:[#allocation5 + $0x144] ss:$8 sps:$4 sm:$0xff]   ;;  %v555_v17 = vld [vmem:[#allocation5 + $0x140] ss:$8 sps:$4 sm:$0xff]   ;;  %vm329_vm1 = vcmask 719872  }
  0x21   :  { %v508_v11 = vcombine.high %v101_v10, %v101_v10  ;;  %v507_v12 = vcombine.low %v101_v10, %v101_v10  ;;  %v533_v15 = vld [vmem:[#allocation5 + $0x24] ss:$8 sps:$4 sm:$0xff]   ;;  %v558_v18 = vld [vmem:[#allocation5 + $0x134] ss:$8 sps:$4 sm:$0xff]   ;;  %v535_v19 = vld [vmem:[#allocation5 + $0x20] ss:$8 sps:$4 sm:$0xff]  }
  0x22   :  { %343 = vmatpush1.bf16.msra.mxu0 %v523_v4  ;;  %v536_v20 = vld [vmem:[#allocation5 + $0x14] ss:$8 sps:$4 sm:$0xff]   ;;  %v561_v21 = vld [vmem:[#allocation5 + $0x130] ss:$8 sps:$4 sm:$0xff]   ;;  %v564_v22 = vld [vmem:[#allocation5 + $0x124] ss:$8 sps:$4 sm:$0xff]  }
  0x23   :  { %344 = vmatprep.subr.bf16.mxu0 %v524_v5  ;;  %509 = vmatprep.subr.msk.bf16.mxu1 %vm333_vm0, %v508_v11  ;;  %v335_v16 = vsel %vm333_vm0, %v507_v12, 0  ;;  %v538_v23 = vld [vmem:[#allocation5 + $0x10] ss:$8 sps:$4 sm:$0xff]   ;;  %v539_v24 = vld [vmem:[#allocation5 + $0x4] ss:$8 sps:$4 sm:$0xff]   ;;  %v105_v57 = vshrl.u32 %v104_v56, 7 }
  0x24   :  { %388 = vmatpush1.bf16.msra.mxu1 %v335_v16  ;;  %v567_v25 = vld [vmem:[#allocation5 + $0x120] ss:$8 sps:$4 sm:$0xff]   ;;  %v570_v26 = vld [vmem:[#allocation5 + $0x114] ss:$8 sps:$4 sm:$0xff]   ;;  %v573_v29 = vld [vmem:[#allocation5 + $0x110] ss:$8 sps:$4 sm:$0xff]  }
  0x25   :  { %389 = vmatprep.subr.bf16.mxu1 %v552_v14  ;;  %v541_v27 = vld [vmem:[#allocation5] ss:$8 sps:$4 sm:$0xff]   ;;  %v542_v28 = vld [vmem:[#allocation5 + $0xf4] ss:$8 sps:$4 sm:$0xff]   ;;  %v576_v32 = vld [vmem:[#allocation5 + $0x104] ss:$8 sps:$4 sm:$0xff]  }
  0x26   :  { %345 = vmatpush1.bf16.msra.mxu0 %v526_v6  ;;  %v51_v30 = vld [vmem:[#allocation3 + $0x8] sm:$0xff]  ;;  %v54_v31 = vld [vmem:[#allocation3 + $0x20] sm:$0xff]  ;;  %v545_v35 = vld [vmem:[#allocation5 + $0xe4] ss:$8 sps:$4 sm:$0xff]   ;;  %v106_v58 = vsub.s32 0, %v105_v57  ;;  %v110_v60 = vsub.s32 1, %v105_v57 }
  0x27   :  { %346 = vmatprep.subr.bf16.mxu0 %v527_v7  ;;  %v57_v33 = vpack.c.bf16 %v54_v31, %v51_v30  ;;  %v544_v34 = vld [vmem:[#allocation5 + $0xf0] ss:$8 sps:$4 sm:$0xff]   ;;  %v579_v36 = vld [vmem:[#allocation5 + $0x100] ss:$8 sps:$4 sm:$0xff]   ;;  %v550_v40 = vld [vmem:[#allocation5 + $0xd4] ss:$8 sps:$4 sm:$0xff]  }
  0x28   :  { %390 = vmatpush1.bf16.msra.mxu1 %v555_v17  ;;  %v52_v37 = vld [vmem:[#allocation3 + $0x10] sm:$0xff]  ;;  %v55_v38 = vld [vmem:[#allocation3 + $0x28] sm:$0xff]  ;;  %v50_v53 = vld [vmem:[#allocation3] sm:$0xff]  ;;  %vm456_vm2 = vcmask 7168  }
  0x29   :  { %391 = vmatprep.subr.bf16.mxu1 %v558_v18  ;;  %372 = vmatprep.mubr.bf16.mxu0 %v57_v33  ;;  %v548_v39 = vld [vmem:[#allocation5 + $0xe0] ss:$8 sps:$4 sm:$0xff]   ;;  %v58_v41 = vpack.c.bf16 %v55_v38, %v52_v37  ;;  %v554_v42 = vld [vmem:[#allocation5 + $0xd0] ss:$8 sps:$4 sm:$0xff]   ;;  %v556_v43 = vld [vmem:[#allocation5 + $0xc4] ss:$8 sps:$4 sm:$0xff]  }
  0x2a   :  { %347 = vmatpush1.bf16.msra.mxu0 %v529_v8  ;;  %v560_v44 = vld [vmem:[#allocation5 + $0xc0] ss:$8 sps:$4 sm:$0xff]   ;;  %v562_v45 = vld [vmem:[#allocation5 + $0xb4] ss:$8 sps:$4 sm:$0xff]   ;;  %v566_v46 = vld [vmem:[#allocation5 + $0xb0] ss:$8 sps:$4 sm:$0xff]  }
  0x2b   :  { %348 = vmatprep.subr.bf16.mxu0 %v530_v9  ;;  %v568_v47 = vld [vmem:[#allocation5 + $0xa4] ss:$8 sps:$4 sm:$0xff]   ;;  %v572_v48 = vld [vmem:[#allocation5 + $0xa0] ss:$8 sps:$4 sm:$0xff]   ;;  %v574_v49 = vld [vmem:[#allocation5 + $0x94] ss:$8 sps:$4 sm:$0xff]  }
  0x2c   :  { %392 = vmatpush1.bf16.msra.mxu1 %v561_v21  ;;  %v578_v50 = vld [vmem:[#allocation5 + $0x90] ss:$8 sps:$4 sm:$0xff]   ;;  %v580_v51 = vld [vmem:[#allocation5 + $0x84] ss:$8 sps:$4 sm:$0xff]   ;;  %v582_v52 = vld [vmem:[#allocation5 + $0x80] ss:$8 sps:$4 sm:$0xff]  }
  0x2d   :  { %393 = vmatprep.subr.bf16.mxu1 %v564_v22  ;;  %v53_v54 = vld [vmem:[#allocation3 + $0x18] sm:$0xff]  ;;  %v102_v59 = vld [vmem:[%s687_s2] sm:$0x3] }
  0x2e   :  { %349 = vmatpush1.bf16.msra.mxu0 %v532_v13  ;;  %v56_v55 = vpack.c.bf16 %v53_v54, %v50_v53  ;;  %v107_v62 = vrot.slane %v102_v59, %v106_v58  ;;  %v111_v63 = vrot.slane %v102_v59, %v110_v60  ;;  %v430_v3 = vld [vmem:[%s688_s3] sm:$0x3] }
  0x2f   :  { %350 = vmatprep.subr.bf16.mxu0 %v533_v15  ;;  %v435_v9 = vrot.slane %v430_v3, %v106_v58  ;;  %v439_v13 = vrot.slane %v430_v3, %v110_v60 }
  0x30   :  { %394 = vmatpush1.bf16.msra.mxu1 %v567_v25 }
  0x31   :  { %395 = vmatprep.subr.bf16.mxu1 %v570_v26 }
  0x32   :  { %351 = vmatpush1.bf16.msra.mxu0 %v535_v19 }
  0x33   :  { %352 = vmatprep.subr.bf16.mxu0 %v536_v20 }
  0x34   :  { %396 = vmatpush1.bf16.msra.mxu1 %v573_v29 }
  0x35   :  { %397 = vmatprep.subr.bf16.mxu1 %v576_v32 }
  0x36   :  { %353 = vmatpush1.bf16.msra.mxu0 %v538_v23 }
  0x37   :  { %354 = vmatprep.subr.bf16.mxu0 %v539_v24 }
  0x38   :  { %398 = vmatpush1.bf16.msra.mxu1 %v579_v36 }
  0x3a   :  { %355 = vmatpush1.bf16.msra.mxu0 %v541_v27 }
  0x3b   :  { %356 = vmatprep.subr.bf16.mxu0 %v542_v28  ;;  %510 = vmatmul.mubr.msk.bf16.vlgmr.msra.gmra.mxu1 %vm329_vm1, %v58_v41  ;;  %v453_v28 = vstv %s689_s4 }
  0x3e   :  { %357 = vmatpush2.bf16.msra.mxu0 %v544_v34 }
  0x3f   :  { %358 = vmatprep.subr.bf16.mxu0 %v545_v35 }
  0x42   :  { %359 = vmatpush2.bf16.msra.mxu0 %v548_v39 }
  0x43   :  { %360 = vmatprep.subr.bf16.mxu0 %v550_v40 }
  0x46   :  { %361 = vmatpush2.bf16.msra.mxu0 %v554_v42 }
  0x47   :  { %362 = vmatprep.subr.bf16.mxu0 %v556_v43 }
  0x4a   :  { %363 = vmatpush2.bf16.msra.mxu0 %v560_v44 }
  0x4b   :  { %364 = vmatprep.subr.bf16.mxu0 %v562_v45 }
  0x4e   :  { %365 = vmatpush2.bf16.msra.mxu0 %v566_v46 }
  0x4f   :  { %366 = vmatprep.subr.bf16.mxu0 %v568_v47 }
  0x52   :  { %367 = vmatpush2.bf16.msra.mxu0 %v572_v48 }
  0x53   :  { %368 = vmatprep.subr.bf16.mxu0 %v574_v49 }
  0x56   :  { %369 = vmatpush2.bf16.msra.mxu0 %v578_v50 }
  0x57   :  { %370 = vmatprep.subr.bf16.mxu0 %v580_v51 }
  0x5a   :  { %371 = vmatpush2.bf16.msra.mxu0 %v582_v52 }
  0x5d   :  { %373 = vmatmul.mubr.bf16.vlgmr.msra.gmra.mxu0 %v56_v55 }
  0xfb   :  { %v417_v61 = vpop.f32.mrf.mxu1 }
  0xfd   :  { %v419_v0 = vpop.f32.mrf.mxu1 }
  0xff   :  { %v421_v7 = vpop.f32.mrf.mxu1 }
 0x101   :  { %v423_v18 = vpop.f32.mrf.mxu1 }
 0x11d   :  { %v374_v1 = vpop.f32.mrf.mxu0 }
 0x11e   :  { %v375_v2 = vadd.f32 %v374_v1, %v107_v62 }
 0x11f   :  { %v376_v4 = vpop.f32.mrf.mxu0 }
 0x120   :  { %v418_v5 = vadd.f32 %v417_v61, %v375_v2  ;;  %v377_v6 = vadd.f32 %v376_v4, %v111_v63 }
 0x121   :  { %v378_v8 = vpop.f32.mrf.mxu0 }
 0x122   :  { %v426_v10 = vmax.f32 %v418_v5, 0.0  ;;  %v420_v11 = vadd.f32 %v419_v0, %v377_v6  ;;  %v379_v12 = vadd.f32 %v378_v8, %v107_v62 }
 0x123   :  { %v380_v14 = vpop.f32.mrf.mxu0 }
 0x124   :  { %v427_v15 = vmax.f32 %v420_v11, 0.0  ;;  %v422_v16 = vadd.f32 %v421_v7, %v379_v12  ;;  %v381_v17 = vadd.f32 %v380_v14, %v111_v63  ;;  %v442_v21 = vmul.f32 %v435_v9, %v426_v10 }
 0x126   :  { %v428_v19 = vmax.f32 %v422_v16, 0.0  ;;  %v424_v20 = vadd.f32 %v423_v18, %v381_v17  ;;  %v443_v22 = vmul.f32 %v439_v13, %v427_v15 }
 0x128   :  { %v429_v23 = vmax.f32 %v424_v20, 0.0  ;;  %v446_v24 = vadd.f32 %v443_v22, %v442_v21  ;;  %v444_v25 = vmul.f32 %v435_v9, %v428_v19 }
 0x12a   :  { %447 = vadd.xlane.f32.xlu0 %v446_v24  ;;  %v445_v26 = vmul.f32 %v439_v13, %v429_v23 }
 0x12c   :  { %v449_v27 = vadd.f32 %v445_v26, %v444_v25 }
 0x12e   :  { %450 = vadd.xlane.f32.xlu0 %v449_v27 }
 0x1b3   :  { %v448_v29 = vpop.xlane.xlu0 %447 }
 0x1b4   :  { %v454_v30 = vadd.f32 %v453_v28, %v448_v29 }
 0x1b6   :  { %457 = vst.msk [vmem:[%s690_s5] sm:$0xff] %vm456_vm2, %v454_v30 }
 0x1b7   :  { %v451_v31 = vpop.xlane.xlu0 %450 }
 0x1b8   :  { %v455_v32 = vadd.f32 %v453_v28, %v451_v31 }
 0x1ba   :  { %458 = vst.msk [vmem:[%s690_s5 + $0x8] sm:$0xff] %vm456_vm2, %v455_v32 }
 0x1bb   :  { %463 = vsyncpa [#allocation4], 1 }
 0x1bc   :  { %464 = vsyncpa [#allocation6], 1 }

</bundles_post_ra>
